<compile_context>
chip_gen: v7x
topology: tpu7x:2x2x1
jax: 0.10.0
libtpu: 0.0.40
codegen_flags: <defaults>
</compile_context>

<pallas_src>
import functools

import jax
import jax.numpy as jnp
from jax import lax
from jax.experimental import pallas as pl
from jax.experimental.pallas import tpu as pltpu

candidate_Cs = [8, 16, 24, 32, 40, 48, 56, 64]


def _relu_conv_bn_kernel(x_ref, w_ref, affine_ref, o_ref, *, KH, KW, dil, Wp, P):
    """One batch element per grid step.

    x_ref      : (1, C_in, L)  bf16  zero-padded, spatially-flattened image,
                 L = Hp*Wp + (KW-1)*dil (tail zeros so every tap slice fits)
    w_ref      : (C_out, KH*KW*C_in)  bf16  im2col weights, col order (kh,kw,ci)
    affine_ref : (C_out, 2) f32   col 0 = BN scale, col 1 = (conv-bias+BN) shift
    o_ref      : (1, C_out, P) f32, P = H1*Wp   "wide" dense-stride output; the
                 W-padding columns contain garbage and are sliced off outside.
    """
    # ReLU once on the whole tile (f32 VALU keeps it v5e-friendly).
    xr = jnp.maximum(x_ref[0].astype(jnp.float32), 0.0)            # (C_in, L)

    # im2col: each (kh, kw) tap is a contiguous lane-slice of the flattened
    # image; stack taps along the contraction axis.
    taps = []
    for kh in range(KH):
        for kw in range(KW):
            base = (kh * Wp + kw) * dil
            taps.append(xr[:, base:base + P])                      # (C_in, P)
    xcol = jnp.concatenate(taps, axis=0).astype(jnp.bfloat16)      # (KH*KW*C_in, P)

    # Single MXU matmul, K = KH*KW*C_in, f32 accumulation.
    acc = jnp.dot(w_ref[...], xcol,
                  preferred_element_type=jnp.float32)              # (C_out, P)

    # Fused conv-bias + eval-mode BatchNorm epilogue.
    scale = affine_ref[:, 0:1]                                     # (C_out, 1)
    shift = affine_ref[:, 1:2]                                     # (C_out, 1)
    o_ref[0] = (acc * scale + shift).astype(o_ref.dtype)


def relu_conv_bn(x_nchw, weight_full, bias_full, gamma, beta, running_mean,
                 running_var, *, in_idx, out_idx, kernel_size, stride,
                 padding, dilation, eps=1e-5):
    """Wrapper: slimmable slicing, parameter folding and layout plumbing."""
    C_in = candidate_Cs[in_idx]
    C_out = candidate_Cs[out_idx]
    N, C, H, W = x_nchw.shape
    assert C == C_in, "input channel count must match candidate_Cs[in_idx]"

    KH = KW = kernel_size
    d = dilation

    # PyTorch conv output size.
    H_out = (H + 2 * padding - d * (KH - 1) - 1) // stride + 1
    W_out = (W + 2 * padding - d * (KW - 1) - 1) // stride + 1

    # Dense (stride-1) geometry computed inside the kernel.
    Hp, Wp = H + 2 * padding, W + 2 * padding
    H1 = Hp - d * (KH - 1)            # dense output rows
    W1 = Wp - d * (KW - 1)            # valid dense output cols per row
    P = H1 * Wp                       # wide flattened spatial extent (lane axis)
    K = KH * KW * C_in                # im2col contraction size
    L = Hp * Wp + (KW - 1) * d        # flattened input length incl. tail zeros

    # --- slimmable slicing (static) + parameter folding (O(C) wrapper work) ---
    w = weight_full[:C_out, :C_in, :, :]                           # (C_out,C_in,KH,KW)
    if bias_full is not None:
        b = bias_full[:C_out].astype(jnp.float32)
    else:
        b = jnp.zeros((C_out,), jnp.float32)
    # im2col weight layout matching the kernel's tap order (kh, kw, c_in).
    w_col = jnp.transpose(w, (0, 2, 3, 1)).reshape(C_out, K).astype(jnp.bfloat16)

    inv_std = lax.rsqrt(running_var.astype(jnp.float32) + eps)
    scale = gamma.astype(jnp.float32) * inv_std
    shift = (b - running_mean.astype(jnp.float32)) * scale + beta.astype(jnp.float32)
    affine = jnp.stack([scale, shift], axis=1)                     # (C_out, 2)

    # --- layout plumbing: pad spatially, flatten HxW, tail-pad, cast to bf16 --
    x_pad = jnp.pad(x_nchw,
                    ((0, 0), (0, 0), (padding, padding), (padding, padding)))
    x_flat = x_pad.reshape(N, C_in, Hp * Wp)
    x_flat = jnp.pad(x_flat, ((0, 0), (0, 0), (0, L - Hp * Wp))).astype(jnp.bfloat16)

    kernel = functools.partial(_relu_conv_bn_kernel,
                               KH=KH, KW=KW, dil=d, Wp=Wp, P=P)

    out_wide = pl.pallas_call(
        kernel,
        out_shape=jax.ShapeDtypeStruct((N, C_out, P), jnp.float32),
        grid=(N,),
        in_specs=[
            pl.BlockSpec((1, C_in, L), lambda n: (n, 0, 0)),
            pl.BlockSpec((C_out, K), lambda n: (0, 0)),
            pl.BlockSpec((C_out, 2), lambda n: (0, 0)),
        ],
        out_specs=pl.BlockSpec((1, C_out, P), lambda n: (n, 0, 0)),
        compiler_params=pltpu.CompilerParams(
            dimension_semantics=("parallel",)),
    )(x_flat, w_col, affine)

    # Wide -> NCHW: drop W-padding columns and apply the conv stride.
    # (For stride > 1 the kernel computes the dense conv and we subsample here;
    #  keeps all in-kernel accesses contiguous at the cost of stride^2 extra
    #  MXU work, which is negligible at these utilizations.)
    out_dense = out_wide.reshape(N, C_out, H1, Wp)
    out = out_dense[:, :, ::stride, :W1:stride]
    assert out.shape == (N, C_out, H_out, W_out)
    return out


def _reference(x_nchw, weight_full, bias_full, gamma, beta, running_mean,
               running_var, *, in_idx, out_idx, kernel_size, stride,
               padding, dilation, eps=1e-5):
    """Pure-JAX f32 reference mirroring the PyTorch module (eval-mode BN)."""
    C_in = candidate_Cs[in_idx]
    C_out = candidate_Cs[out_idx]
    w = weight_full[:C_out, :C_in, :, :]
    b = bias_full[:C_out] if bias_full is not None else jnp.zeros((C_out,))
    xr = jnp.maximum(x_nchw, 0.0)
    conv = lax.conv_general_dilated(
        xr, w, window_strides=(stride, stride),
        padding=[(padding, padding), (padding, padding)],
        rhs_dilation=(dilation, dilation),
        dimension_numbers=("NCHW", "OIHW", "NCHW"))
    conv = conv + b[None, :, None, None]
    inv_std = 1.0 / jnp.sqrt(running_var + eps)
    scale = (gamma * inv_std)[None, :, None, None]
    shift = (beta - running_mean * gamma * inv_std)[None, :, None, None]
    return conv * scale + shift


if __name__ == "__main__":
    # ReLUConvBN(C_in, C_out, k, stride, padding, dilation, affine=False)
    # affine=False -> the slimmable conv has a bias.
    kernel_size, stride, padding, dilation = 3, 1, 1, 1
    in_idx, out_idx = 0, 1                  # C_in = 8, C_out = 16
    C_in, C_out = candidate_Cs[in_idx], candidate_Cs[out_idx]
    N, H, W = 2, 16, 16
    C_max = max(candidate_Cs)

    key = jax.random.PRNGKey(0)
    k_x, k_w, k_b, k_g, k_be, k_m, k_v = jax.random.split(key, 7)

    x = jax.random.normal(k_x, (N, C_in, H, W), dtype=jnp.float32)

    # SlimmableConv2d parameters: full-size (max channels) weight / bias.
    weight_full = 0.1 * jax.random.normal(
        k_w, (C_max, C_max, kernel_size, kernel_size), dtype=jnp.float32)
    bias_full = 0.1 * jax.random.normal(k_b, (C_max,), dtype=jnp.float32)

    # SwitchableBatchNorm2d: the BN selected by out_idx has C_out features.
    gamma = 1.0 + 0.1 * jax.random.normal(k_g, (C_out,), dtype=jnp.float32)
    beta = 0.1 * jax.random.normal(k_be, (C_out,), dtype=jnp.float32)
    running_mean = 0.1 * jax.random.normal(k_m, (C_out,), dtype=jnp.float32)
    running_var = jax.random.uniform(k_v, (C_out,), minval=0.5, maxval=1.5,
                                     dtype=jnp.float32)
    # TODO(synk): training-mode BN (batch statistics over N,H,W + running-stat
    # update) not implemented; eval-mode BN with running stats is used here.

    fn = jax.jit(functools.partial(
        relu_conv_bn, in_idx=in_idx, out_idx=out_idx, kernel_size=kernel_size,
        stride=stride, padding=padding, dilation=dilation))

    out = fn(x, weight_full, bias_full, gamma, beta, running_mean, running_var)
    out = jax.block_until_ready(out)

    ref = _reference(
        x, weight_full, bias_full, gamma, beta, running_mean, running_var,
        in_idx=in_idx, out_idx=out_idx, kernel_size=kernel_size,
        stride=stride, padding=padding, dilation=dilation)

    assert out.shape == (N, C_out, H, W)
    # bf16 activations/weights with f32 accumulation -> relaxed tolerance.
    assert jnp.allclose(out, ref, rtol=2e-2, atol=2e-2)
    print("KERNEL_OK")
</pallas_src>

<mosaic_0001>
module attributes {stable_mosaic.version = 11 : i64} {
  func.func @_relu_conv_bn_kernel(%arg0: i32, %arg1: memref<1x8x326xbf16, #tpu.memory_space<vmem>>, %arg2: memref<16x72xbf16, #tpu.memory_space<vmem>>, %arg3: memref<16x2xf32, #tpu.memory_space<vmem>>, %arg4: memref<1x16x288xf32, #tpu.memory_space<vmem>>) attributes {dimension_semantics = [#tpu.dimension_semantics<parallel>], iteration_bounds = array<i64: 2>, scalar_prefetch = 0 : i64, scratch_operands = 0 : i64, tpu.core_type = #tpu.core_type<tc>, window_params = [{transform_indices = @transform_0, window_bounds = array<i64: 1, 8, 326>}, {pipeline_mode = #tpu.pipeline_mode<synchronous>, transform_indices = @transform_1, window_bounds = array<i64: 16, 72>}, {pipeline_mode = #tpu.pipeline_mode<synchronous>, transform_indices = @transform_2, window_bounds = array<i64: 16, 2>}, {transform_indices = @transform_3, window_bounds = array<i64: 1, 16, 288>}]} {
    %c0 = arith.constant 0 : index
    %c0_0 = arith.constant 0 : index
    %c0_1 = arith.constant 0 : index
    %0 = vector.load %arg1[%c0, %c0_0, %c0_1] : memref<1x8x326xbf16, #tpu.memory_space<vmem>>, vector<1x8x326xbf16>
    %1 = vector.shape_cast %0 : vector<1x8x326xbf16> to vector<8x326xbf16>
    %2 = arith.extf %1 : vector<8x326xbf16> to vector<8x326xf32>
    %cst = arith.constant 0.000000e+00 : f32
    %3 = vector.broadcast %cst : f32 to vector<8x326xf32>
    %4 = arith.maximumf %2, %3 : vector<8x326xf32>
    %5 = vector.extract_strided_slice %4 {offsets = [0, 0], sizes = [8, 288], strides = [1, 1]} : vector<8x326xf32> to vector<8x288xf32>
    %6 = vector.extract_strided_slice %4 {offsets = [0, 1], sizes = [8, 288], strides = [1, 1]} : vector<8x326xf32> to vector<8x288xf32>
    %7 = vector.extract_strided_slice %4 {offsets = [0, 2], sizes = [8, 288], strides = [1, 1]} : vector<8x326xf32> to vector<8x288xf32>
    %8 = vector.extract_strided_slice %4 {offsets = [0, 18], sizes = [8, 288], strides = [1, 1]} : vector<8x326xf32> to vector<8x288xf32>
    %9 = vector.extract_strided_slice %4 {offsets = [0, 19], sizes = [8, 288], strides = [1, 1]} : vector<8x326xf32> to vector<8x288xf32>
    %10 = vector.extract_strided_slice %4 {offsets = [0, 20], sizes = [8, 288], strides = [1, 1]} : vector<8x326xf32> to vector<8x288xf32>
    %11 = vector.extract_strided_slice %4 {offsets = [0, 36], sizes = [8, 288], strides = [1, 1]} : vector<8x326xf32> to vector<8x288xf32>
    %12 = vector.extract_strided_slice %4 {offsets = [0, 37], sizes = [8, 288], strides = [1, 1]} : vector<8x326xf32> to vector<8x288xf32>
    %13 = vector.extract_strided_slice %4 {offsets = [0, 38], sizes = [8, 288], strides = [1, 1]} : vector<8x326xf32> to vector<8x288xf32>
    %14 = tpu.concatenate %5, %6, %7, %8, %9, %10, %11, %12, %13 in 0 : vector<8x288xf32>, vector<8x288xf32>, vector<8x288xf32>, vector<8x288xf32>, vector<8x288xf32>, vector<8x288xf32>, vector<8x288xf32>, vector<8x288xf32>, vector<8x288xf32> -> vector<72x288xf32>
    %15 = arith.truncf %14 : vector<72x288xf32> to vector<72x288xbf16>
    %c0_2 = arith.constant 0 : index
    %c0_3 = arith.constant 0 : index
    %16 = vector.load %arg2[%c0_2, %c0_3] : memref<16x72xbf16, #tpu.memory_space<vmem>>, vector<16x72xbf16>
    %cst_4 = arith.constant dense<0.000000e+00> : vector<16x288xf32>
    %17 = tpu.matmul %16, %15, %cst_4 {dimension_numbers = #tpu.dot_dimension_numbers<[1], [0], [0], [1], [0, 0, 1, 1], [], []>} : vector<16x72xbf16>, vector<72x288xbf16>, vector<16x288xf32> -> vector<16x288xf32>
    %c0_5 = arith.constant 0 : index
    %c0_6 = arith.constant 0 : index
    %18 = vector.load %arg3[%c0_5, %c0_6] : memref<16x2xf32, #tpu.memory_space<vmem>>, vector<16x1xf32>
    %c0_7 = arith.constant 0 : index
    %c1 = arith.constant 1 : index
    %19 = vector.load %arg3[%c0_7, %c1] : memref<16x2xf32, #tpu.memory_space<vmem>>, vector<16x1xf32>
    %20 = vector.broadcast %18 : vector<16x1xf32> to vector<16x288xf32>
    %21 = arith.mulf %17, %20 : vector<16x288xf32>
    %22 = vector.broadcast %19 : vector<16x1xf32> to vector<16x288xf32>
    %23 = arith.addf %21, %22 : vector<16x288xf32>
    %c0_8 = arith.constant 0 : index
    %c0_9 = arith.constant 0 : index
    %c0_10 = arith.constant 0 : index
    %24 = vector.load %arg4[%c0_8, %c0_9, %c0_10] : memref<1x16x288xf32, #tpu.memory_space<vmem>>, vector<1x16x288xf32>
    %25 = vector.shape_cast %24 : vector<1x16x288xf32> to vector<16x288xf32>
    %26 = vector.shape_cast %23 : vector<16x288xf32> to vector<1x16x288xf32>
    tpu.vector_store %arg4[%c0_8, %c0_9, %c0_10], %26 {strides = array<i32>} : memref<1x16x288xf32, #tpu.memory_space<vmem>>, vector<1x16x288xf32>,
    return
  }
  func.func @transform_0(%arg0: i32) -> (i32, i32, i32) {
    %c0_i32 = arith.constant 0 : i32
    %c0_i32_0 = arith.constant 0 : i32
    %c0_i32_1 = arith.constant 0 : i32
    return %arg0, %c0_i32, %c0_i32_0 : i32, i32, i32
  }
  func.func @transform_1(%arg0: i32) -> (i32, i32) {
    %c0_i32 = arith.constant 0 : i32
    %c0_i32_0 = arith.constant 0 : i32
    %c0_i32_1 = arith.constant 0 : i32
    return %c0_i32, %c0_i32_0 : i32, i32
  }
  func.func @transform_2(%arg0: i32) -> (i32, i32) {
    %c0_i32 = arith.constant 0 : i32
    %c0_i32_0 = arith.constant 0 : i32
    %c0_i32_1 = arith.constant 0 : i32
    return %c0_i32, %c0_i32_0 : i32, i32
  }
  func.func @transform_3(%arg0: i32) -> (i32, i32, i32) {
    %c0_i32 = arith.constant 0 : i32
    %c0_i32_0 = arith.constant 0 : i32
    %c0_i32_1 = arith.constant 0 : i32
    return %arg0, %c0_i32, %c0_i32_0 : i32, i32, i32
  }
}

</mosaic_0001>

<bundles_post_ra>
// kernel: relu_conv_bn.1
= control target key start
LH: loop header
LB: loop body
LE: loop exit
PB: predicated region body
PF: predicated region fallthrough
CT: control target
= control target key end

     0   :  { %s633_s12 = smov 0   ;;  %s680_s0 = inlined_call_operand.vmem [shape: bf16[2,8,326], index: 0, kind: input, shape index: {}]   ;;  %s681_s1 = inlined_call_operand.vmem [shape: bf16[16,72], index: 1, kind: input, shape index: {}]   ;;  %s682_s2 = inlined_call_operand.vmem [shape: f32[16,2], index: 2, kind: input, shape index: {}]   ;;  %s683_s3 = inlined_call_operand.vmem [shape: f32[2,16,288], index: 3, kind: output, shape index: {}]  }
   0x1 LB: > { %s493_s13 = sadd.s32 4294967295, %s599_s12   ;;  %p497_p0 = scmp.ge.s32.totalorder %s599_s12, 1  ;;  %s599_s12 = sphi %s633_s12, %s13_s12  }
   0x2   : > { %p137_p1 = scmp.lt.s32.totalorder %s599_s12, 3 }
   0x4   : > { %p138_p2 = pnand %p497_p0, %p137_p1 }
   0x5   : > { %p161_p3 = scmp.lt.s32.totalorder (!%p138_p2), %s493_s13, 1  ;;  %v601_v0 = vmov (!%p138_p2), 0.0   ;;  %s602_s18 = smov (!%p138_p2), 126   ;;  %vm609_vm0 = vmmov (!%p138_p2), 0   ;;  %v610_v10 = vmov (!%p138_p2), 0   ;;  %v400_v12 = vld [vmem:[%s682_s2 + $0x8] sm:$0xff] (!%p138_p2) }
   0x6   : > { %141 = sbr.rel (%p138_p2) target bundleno = 396 (0x18c), region = 32  ;;  %512 = vmatprep.subr.bf16.mxu1 (!%p138_p2), %v601_v0  ;;  %s603_s19 = smov (!%p138_p2), 127   ;;  %522 = vmatprep.mubr.msk.bf16.mxu1 (!%p138_p2), %vm609_vm0, %v601_v0  ;;  %v399_v13 = vld [vmem:[%s682_s2] sm:$0xff] (!%p138_p2)  ;;  %v612_v14 = vmov (!%p138_p2), 1   ;;  %vm189_vm1 = vcmask (!%p138_p2), 1039360   ;;  %vm213_vm2 = vcmask (!%p138_p2), 900096  }
   0x7   : > { %s604_s20 = smov (!%p138_p2), 110   ;;  %s605_s21 = smov (!%p138_p2), 108   ;;  %347 = vmatprep.mubr.bf16.mxu0 (!%p138_p2), %v610_v10  ;;  %589 = vset.pattern.permute.xlu1 (!%p138_p2), %v610_v10  ;;  %vm201_vm3 = vcmask (!%p138_p2), 1031168   ;;  %vm237_vm4 = vcmask (!%p138_p2), 883712   ;;  %vm225_vm5 = vcmask (!%p138_p2), 891904   ;;  %vm261_vm6 = vcmask (!%p138_p2), 744448  }
   0x8   : > { %s606_s22 = smov (!%p138_p2), 109   ;;  %s607_s23 = smov (!%p138_p2), 91   ;;  %588 = vset.pattern.permute.xlu0 (!%p138_p2), %v610_v10  ;;  %vm249_vm7 = vcmask (!%p138_p2), 752640   ;;  %vm273_vm8 = vcmask (!%p138_p2), 736256   ;;  %vm305_vm9 = vcmask (!%p138_p2), 1043456   ;;  %vm301_vm10 = vcmask (!%p138_p2), 588800  }
   0x9   : > { %s608_s24 = smov (!%p138_p2), 92   ;;  %s611_s25 = smov (!%p138_p2), 90   ;;  %vm433_vm11 = vcmask (!%p138_p2), 261120  }
   0xd   : > { %s685_s13 = smov (!%p161_p3, %s493_s13), 1 }
   0xe   : > { %s526_s14 = smul.u32 12, %s685_s13 }
   0xf   : > { %s527_s5 = smul.u32 48, %s685_s13 }
  0x10   : > { %s165_s17 = scalar_lea.vmem %s680_s0, %s526_s14 }
  0x11   : > { %v172_v1 = vld [vmem:[%s165_s17] sm:$0xff]  ;;  %v173_v2 = vld [vmem:[%s165_s17 + $0x8] sm:$0xf]  ;;  %s170_s8 = scalar_lea.vmem %s683_s3, %s527_s5 }
  0x12   : > { %v175_v3 = vunpack.c.h.bf16 %v172_v1  ;;  %v176_v4 = vunpack.c.l.bf16 %v173_v2  ;;  %v174_v7 = vunpack.c.l.bf16 %v172_v1 }
  0x14   : > { %v648_v5 = vmax.f32 %v175_v3, 0.0  ;;  %v179_v6 = vmax.f32 %v176_v4, 0.0  ;;  %v177_v9 = vmax.f32 %v174_v7, 0.0 }
  0x16   : > { %v553_v8 = vpack.i.bf16 %v179_v6, %v648_v5  ;;  %v583_v11 = vpack.i.bf16 %v648_v5, %v177_v9 }
  0x18   : > { %554 = vrot.lane.b32.xlu1 %v553_v8, %s602_s18  ;;  %549 = vrot.lane.b32.xlu0 %v553_v8, %s603_s19 }
  0x1c   : > { %559 = vrot.lane.b32.xlu1 %v553_v8, %s604_s20  ;;  %183 = vrot.lane.b32.xlu0 %v177_v9, %s603_s19 }
  0x20   : > { %207 = vrot.lane.b32.xlu1 %v177_v9, %s604_s20  ;;  %195 = vrot.lane.b32.xlu0 %v177_v9, %s602_s18 }
  0x24   : > { %569 = vrot.lane.b32.xlu1 %v553_v8, %s605_s21  ;;  %564 = vrot.lane.b32.xlu0 %v553_v8, %s606_s22 }
  0x28   : > { %231 = vrot.lane.b32.xlu1 %v177_v9, %s605_s21  ;;  %219 = vrot.lane.b32.xlu0 %v177_v9, %s606_s22 }
  0x2c   : > { %579 = vrot.lane.b32.xlu1 %v553_v8, %s607_s23  ;;  %574 = vrot.lane.b32.xlu0 %v553_v8, %s608_s24 }
  0x30   : > { %255 = vrot.lane.b32.xlu1 %v177_v9, %s607_s23  ;;  %243 = vrot.lane.b32.xlu0 %v177_v9, %s608_s24 }
  0x34   : > { %584 = vrot.lane.b32.xlu0 %v583_v11, %s611_s25  ;;  %271 = vrot.lane.b32.xlu1 %v179_v6, %s611_s25 }
  0x38   : > { %408 = vperm.xlu1 %589, %v400_v12   ;;  %403 = vperm.xlu0 %588, %v399_v13  }
  0x3c   : > { %590 = vset.pattern.permute.xlu1 %v612_v14  ;;  %591 = vset.pattern.permute.xlu0 %v612_v14  ;;  %v592_v14 = vld [vmem:[%s681_s1] sm:$0xff]  }
  0x3d   : > { %418 = vperm.xlu1 %590, %v399_v13   ;;  %422 = vperm.xlu0 %591, %v400_v12  }
  0x8a   : > { %v555_v15 = vpop.permute.xlu1 %554  ;;  %v550_v16 = vpop.permute.xlu0 %549 }
  0x8b   : > { %v552_v17 = vunpack.i.h.bf16 %v550_v16  ;;  %v551_v18 = vunpack.i.l.bf16 %v550_v16  ;;  %v557_v19 = vunpack.i.h.bf16 %v555_v15  ;;  %v556_v20 = vunpack.i.l.bf16 %v555_v15 }
  0x8d   : > { %v281_v21 = vpack.c.bf16 %v552_v17, %v179_v6  ;;  %v191_v22 = vsel %vm189_vm1, %v551_v18, %v552_v17  ;;  %v203_v31 = vsel %vm201_vm3, %v556_v20, %v557_v19 }
  0x8e   : > { %v560_v23 = vpop.permute.xlu1 %559  ;;  %v184_v24 = vpop.permute.xlu0 %183  ;;  %v280_v25 = vpack.c.bf16 %v191_v22, %v648_v5 }
  0x8f   : > { %v562_v26 = vunpack.i.h.bf16 %v560_v23  ;;  %v561_v27 = vunpack.i.l.bf16 %v560_v23  ;;  %v190_v28 = vsel %vm189_vm1, %v184_v24, %v551_v18  ;;  %513 = vmatpush3.bf16.msra.mxu1 %v281_v21 }
  0x90   : > { %315 = vmatprep.subr.bf16.mxu0 %v280_v25  ;;  %514 = vmatprep.subr.bf16.mxu1 %v601_v0  ;;  %v279_v29 = vpack.c.bf16 %v190_v28, %v177_v9 }
  0x91   : > { %v284_v30 = vpack.c.bf16 %v562_v26, %v557_v19  ;;  %v215_v32 = vsel %vm213_vm2, %v561_v27, %v562_v26 }
  0x92   : > { %v208_v33 = vpop.permute.xlu1 %207  ;;  %316 = vmatpush1.bf16.msra.mxu0 %v279_v29  ;;  %v196_v34 = vpop.permute.xlu0 %195  ;;  %v283_v35 = vpack.c.bf16 %v215_v32, %v203_v31 }
  0x93   : > { %v214_v36 = vsel %vm213_vm2, %v208_v33, %v561_v27  ;;  %v202_v37 = vsel %vm201_vm3, %v196_v34, %v556_v20  ;;  %515 = vmatpush3.bf16.msra.mxu1 %v284_v30 }
  0x94   : > { %v282_v38 = vpack.c.bf16 %v214_v36, %v202_v37  ;;  %317 = vmatprep.subr.bf16.mxu0 %v283_v35  ;;  %516 = vmatprep.subr.bf16.mxu1 %v601_v0 }
  0x96   : > { %v570_v39 = vpop.permute.xlu1 %569  ;;  %318 = vmatpush1.bf16.msra.mxu0 %v282_v38  ;;  %v565_v40 = vpop.permute.xlu0 %564 }
  0x97   : > { %v572_v41 = vunpack.i.h.bf16 %v570_v39  ;;  %v571_v42 = vunpack.i.l.bf16 %v570_v39  ;;  %v567_v43 = vunpack.i.h.bf16 %v565_v40  ;;  %v566_v44 = vunpack.i.l.bf16 %v565_v40 }
  0x99   : > { %v287_v45 = vpack.c.bf16 %v572_v41, %v567_v43  ;;  %v227_v46 = vsel %vm225_vm5, %v566_v44, %v567_v43  ;;  %v239_v47 = vsel %vm237_vm4, %v571_v42, %v572_v41 }
  0x9a   : > { %v232_v48 = vpop.permute.xlu1 %231  ;;  %v220_v49 = vpop.permute.xlu0 %219  ;;  %v286_v50 = vpack.c.bf16 %v239_v47, %v227_v46 }
  0x9b   : > { %v238_v51 = vsel %vm237_vm4, %v232_v48, %v571_v42  ;;  %v226_v52 = vsel %vm225_vm5, %v220_v49, %v566_v44  ;;  %517 = vmatpush3.bf16.msra.mxu1 %v287_v45 }
  0x9c   : > { %v285_v53 = vpack.c.bf16 %v238_v51, %v226_v52  ;;  %319 = vmatprep.subr.bf16.mxu0 %v286_v50  ;;  %518 = vmatprep.subr.bf16.mxu1 %v601_v0 }
  0x9e   : > { %v580_v54 = vpop.permute.xlu1 %579  ;;  %v575_v55 = vpop.permute.xlu0 %574  ;;  %320 = vmatpush1.bf16.msra.mxu0 %v285_v53 }
  0x9f   : > { %v582_v56 = vunpack.i.h.bf16 %v580_v54  ;;  %v581_v57 = vunpack.i.l.bf16 %v580_v54  ;;  %v577_v58 = vunpack.i.h.bf16 %v575_v55  ;;  %v576_v59 = vunpack.i.l.bf16 %v575_v55 }
  0xa1   : > { %v290_v60 = vpack.c.bf16 %v582_v56, %v577_v58  ;;  %v251_v61 = vsel %vm249_vm7, %v576_v59, %v577_v58  ;;  %v263_v62 = vsel %vm261_vm6, %v581_v57, %v582_v56 }
  0xa2   : > { %v256_v63 = vpop.permute.xlu1 %255  ;;  %v244_v1 = vpop.permute.xlu0 %243  ;;  %v289_v2 = vpack.c.bf16 %v263_v62, %v251_v61 }
  0xa3   : > { %v262_v3 = vsel %vm261_vm6, %v256_v63, %v581_v57  ;;  %v250_v4 = vsel %vm249_vm7, %v244_v1, %v576_v59  ;;  %519 = vmatpush3.bf16.msra.mxu1 %v290_v60 }
  0xa4   : > { %v288_v5 = vpack.c.bf16 %v262_v3, %v250_v4  ;;  %321 = vmatprep.subr.bf16.mxu0 %v289_v2  ;;  %520 = vmatprep.subr.bf16.mxu1 %v601_v0 }
  0xa6   : > { %v585_v6 = vpop.permute.xlu0 %584  ;;  %322 = vmatpush1.bf16.msra.mxu0 %v288_v5  ;;  %v272_v7 = vpop.permute.xlu1 %271 }
  0xa7   : > { %v587_v8 = vunpack.i.h.bf16 %v585_v6  ;;  %v586_v9 = vunpack.i.l.bf16 %v585_v6  ;;  %v293_v10 = vpack.c.bf16 %v272_v7, %v272_v7 }
  0xa9   : > { %v275_v11 = vsel %vm273_vm8, %v587_v8, %v272_v7  ;;  %v313_v12 = vsel %vm305_vm9, %v293_v10, 0  ;;  %v274_v13 = vsel %vm273_vm8, %v586_v9, %v587_v8 }
  0xaa   : > { %v292_v15 = vpack.c.bf16 %v275_v11, %v275_v11  ;;  %521 = vmatpush3.bf16.msra.mxu1 %v313_v12  ;;  %v291_v16 = vpack.c.bf16 %v274_v13, %v274_v13 }
  0xac   : > { %501 = vmatprep.subr.msk.bf16.mxu0 %vm305_vm9, %v292_v15  ;;  %v307_v0 = vsel %vm305_vm9, %v291_v16, 0 }
  0xad   : > { %324 = vmatpush1.bf16.msra.mxu0 %v307_v0  ;;  %523 = vmatmul.mubr.msk.bf16.vlgmr.msra.gmra.mrb[0].mxu1 %vm301_vm10, %v592_v14 }
  0xb0   : > { %502 = vmatmul.mubr.msk.bf16.vlgmr.msra.gmra.mrb[0].mxu0 %vm301_vm10, %v592_v14 }
  0xb7   : > { %v409_v17 = vpop.permute.xlu1 %408  ;;  %v404_v18 = vpop.permute.xlu0 %403 }
  0xbc   : > { %v419_v20 = vpop.permute.xlu1 %418  ;;  %v423_v24 = vpop.permute.xlu0 %422 }
 0x180   : > { %v392_v19 = vpop.f32.mrb[0].mxu1 }
 0x181   : > { %v413_v21 = vmul.f32 %v404_v18, %v392_v19  ;;  %v524_v22 = vpop.f32.mrb[1].mxu1 }
 0x182   : > { %v395_v23 = vpop.f32.mrb[2].mxu1 }
 0x183   : > { %v349_v25 = vpop.f32.mrb[0].mxu0  ;;  %v416_v26 = vmul.f32 %v409_v17, %v395_v23  ;;  %v525_v27 = vpop.f32.mrb[3].mxu1  ;;  %v427_v28 = vadd.f32 %v419_v20, %v413_v21 }
 0x184   : > { %v411_v29 = vmul.f32 %v404_v18, %v349_v25  ;;  %v351_v30 = vpop.f32.mrb[1].mxu0 }
 0x185   : > { %v412_v31 = vmul.f32 %v404_v18, %v351_v30  ;;  %434 = vst.msk [vmem:[%s170_s8 + $0x10] sm:$0xff] %vm433_vm11, %v427_v28  ;;  %v430_v32 = vadd.f32 %v423_v24, %v416_v26  ;;  %v353_v33 = vpop.f32.mrb[2].mxu0 }
 0x186   : > { %v425_v34 = vadd.f32 %v419_v20, %v411_v29  ;;  %v414_v35 = vmul.f32 %v409_v17, %v353_v33  ;;  %v355_v36 = vpop.f32.mrb[3].mxu0 }
 0x187   : > { %v426_v37 = vadd.f32 %v419_v20, %v412_v31  ;;  %437 = vst.msk [vmem:[%s170_s8 + $0x28] sm:$0xff] %vm433_vm11, %v430_v32  ;;  %v415_v38 = vmul.f32 %v409_v17, %v355_v36 }
 0x188   : > { %431 = vst [vmem:[%s170_s8] sm:$0xff] %v425_v34  ;;  %v428_v39 = vadd.f32 %v423_v24, %v414_v35 }
 0x189   : > { %432 = vst [vmem:[%s170_s8 + $0x8] sm:$0xff] %v426_v37  ;;  %v429_v40 = vadd.f32 %v423_v24, %v415_v38 }
 0x18a   : > { %435 = vst [vmem:[%s170_s8 + $0x18] sm:$0xff] %v428_v39 }
 0x18b   : > { %436 = vst [vmem:[%s170_s8 + $0x20] sm:$0xff] %v429_v40 }
 0x18c PF: > { %s13_s12 = sadd.s32 1, %s599_s12  }
 0x18d   : > { %p10_p4 = scmp.ge.s32.totalorder %s13_s12, 4  }
 0x18f   :  { %12 = sbr.rel (!%p10_p4) target bundleno = 1 (0x1), region = 62 }

</bundles_post_ra>
